<compile_context>
chip_gen: v5e
topology: v5e:2x2
jax: 0.10.0
libtpu: 0.0.40
codegen_flags: <defaults>
</compile_context>

<pallas_src>
import jax
import jax.numpy as jnp
from jax.experimental import pallas as pl
from jax.experimental.pallas import tpu as pltpu


def _round_up(x, m):
    return ((x + m - 1) // m) * m


def letter_fnn_kernel(x_ref,
                      w1_ref, b1_ref,
                      w2_ref, b2_ref,
                      w3_ref, b3_ref,
                      w4_ref, b4_ref,
                      w5_ref, b5_ref,
                      o_ref):
    # L1 + ReLU
    h = jnp.dot(x_ref[...], w1_ref[...],
                preferred_element_type=jnp.float32) + b1_ref[...]
    h = jnp.maximum(h, 0.0)
    # L2 + ReLU
    h = jnp.dot(h, w2_ref[...],
                preferred_element_type=jnp.float32) + b2_ref[...]
    h = jnp.maximum(h, 0.0)
    # L3 + ReLU
    h = jnp.dot(h, w3_ref[...],
                preferred_element_type=jnp.float32) + b3_ref[...]
    h = jnp.maximum(h, 0.0)
    # L4 + ReLU
    h = jnp.dot(h, w4_ref[...],
                preferred_element_type=jnp.float32) + b4_ref[...]
    h = jnp.maximum(h, 0.0)
    # out (no activation), lane-dense padded write
    out = jnp.dot(h, w5_ref[...],
                  preferred_element_type=jnp.float32) + b5_ref[...]
    o_ref[...] = out.astype(o_ref.dtype)


def letter_fnn_forward(x, params, tile_b=256):
    """x: (B, input_size) f32; params: list of (W, b), W (in, out), b (1, out)."""
    B, input_size = x.shape
    num_classes = params[-1][0].shape[1]

    # Batch tile: multiple of 256 for v6e/v7x MXU; shrink (sublane-aligned) for
    # tiny demo batches so we do not pad a batch of 8 up to 256.
    tile_b = min(tile_b, _round_up(B, 8))
    B_pad = _round_up(B, tile_b)
    if B_pad != B:
        x = jnp.pad(x, ((0, B_pad - B), (0, 0)))

    # Pad the final layer's output dim up to a lane-dense multiple of 128.
    nc_pad = _round_up(num_classes, 128)
    w5, b5 = params[-1]
    if nc_pad != num_classes:
        w5 = jnp.pad(w5, ((0, 0), (0, nc_pad - num_classes)))
        b5 = jnp.pad(b5, ((0, 0), (0, nc_pad - num_classes)))
    padded_params = list(params[:-1]) + [(w5, b5)]

    flat_args = [x]
    in_specs = [pl.BlockSpec((tile_b, input_size), lambda i: (i, 0))]
    for w, b in padded_params:
        flat_args.extend([w, b])
        # Weights / biases: full-array blocks, constant index_map -> stay
        # VMEM-resident across grid steps (no re-DMA).
        in_specs.append(pl.BlockSpec(w.shape, lambda i: (0, 0)))
        in_specs.append(pl.BlockSpec(b.shape, lambda i: (0, 0)))

    out_spec = pl.BlockSpec((tile_b, nc_pad), lambda i: (i, 0))

    dims = [input_size] + [w.shape[1] for (w, _) in padded_params]
    flops = 2 * B_pad * sum(dims[i] * dims[i + 1] for i in range(len(dims) - 1))
    weight_bytes = sum(w.size * w.dtype.itemsize + b.size * b.dtype.itemsize
                       for (w, b) in padded_params)
    bytes_accessed = weight_bytes + B_pad * (input_size + nc_pad) * 4
    cost = pl.CostEstimate(flops=flops, transcendentals=0,
                           bytes_accessed=bytes_accessed)

    out_padded = pl.pallas_call(
        letter_fnn_kernel,
        out_shape=jax.ShapeDtypeStruct((B_pad, nc_pad), jnp.float32),
        grid=(B_pad // tile_b,),
        in_specs=in_specs,
        out_specs=out_spec,
        compiler_params=pltpu.CompilerParams(
            dimension_semantics=("parallel",)),
        cost_estimate=cost,
    )(*flat_args)

    return out_padded[:B, :num_classes]


def init_params(key, input_size, num_classes):
    """Deterministic init mimicking PyTorch Linear default (uniform +/- 1/sqrt(fan_in))."""
    dims = [input_size, 512, 256, 128, 64, num_classes]
    params = []
    for i in range(len(dims) - 1):
        fan_in, fan_out = dims[i], dims[i + 1]
        key, kw, kb = jax.random.split(key, 3)
        bound = 1.0 / (fan_in ** 0.5)
        # stored as (in, out) == PyTorch weight (out, in) transposed
        w = jax.random.uniform(kw, (fan_in, fan_out), jnp.float32, -bound, bound)
        b = jax.random.uniform(kb, (1, fan_out), jnp.float32, -bound, bound)
        params.append((w, b))
    return params


def reference_forward(x, params):
    h = x
    for i, (w, b) in enumerate(params):
        h = h @ w + b
        if i < len(params) - 1:
            h = jnp.maximum(h, 0.0)
    return h


if __name__ == "__main__":
    key = jax.random.PRNGKey(0)
    key, kx = jax.random.split(key)

    batch = 8
    input_size = 128      # e.g. flattened letter features
    num_classes = 26      # A..Z

    x = jax.random.normal(kx, (batch, input_size), jnp.float32)
    params = init_params(key, input_size, num_classes)

    out = letter_fnn_forward(x, params)
    out = jax.block_until_ready(out)

    ref = reference_forward(x, params)
    assert out.shape == (batch, num_classes)
    assert jnp.allclose(out, ref, atol=1e-4, rtol=1e-4)

    print("KERNEL_OK")
</pallas_src>

<mosaic_0001>
module attributes {stable_mosaic.version = 11 : i64} {
  func.func @letter_fnn_kernel(%arg0: i32, %arg1: memref<8x128xf32, #tpu.memory_space<vmem>>, %arg2: memref<128x512xf32, #tpu.memory_space<vmem>>, %arg3: memref<1x512xf32, #tpu.memory_space<vmem>>, %arg4: memref<512x256xf32, #tpu.memory_space<vmem>>, %arg5: memref<1x256xf32, #tpu.memory_space<vmem>>, %arg6: memref<256x128xf32, #tpu.memory_space<vmem>>, %arg7: memref<1x128xf32, #tpu.memory_space<vmem>>, %arg8: memref<128x64xf32, #tpu.memory_space<vmem>>, %arg9: memref<1x64xf32, #tpu.memory_space<vmem>>, %arg10: memref<64x128xf32, #tpu.memory_space<vmem>>, %arg11: memref<1x128xf32, #tpu.memory_space<vmem>>, %arg12: memref<8x128xf32, #tpu.memory_space<vmem>>) attributes {dimension_semantics = [#tpu.dimension_semantics<parallel>], iteration_bounds = array<i64: 1>, scalar_prefetch = 0 : i64, scratch_operands = 0 : i64, tpu.core_type = #tpu.core_type<tc>, window_params = [{transform_indices = @transform_0, window_bounds = array<i64: 8, 128>}, {pipeline_mode = #tpu.pipeline_mode<synchronous>, transform_indices = @transform_1, window_bounds = array<i64: 128, 512>}, {pipeline_mode = #tpu.pipeline_mode<synchronous>, transform_indices = @transform_2, window_bounds = array<i64: 1, 512>}, {pipeline_mode = #tpu.pipeline_mode<synchronous>, transform_indices = @transform_3, window_bounds = array<i64: 512, 256>}, {pipeline_mode = #tpu.pipeline_mode<synchronous>, transform_indices = @transform_4, window_bounds = array<i64: 1, 256>}, {pipeline_mode = #tpu.pipeline_mode<synchronous>, transform_indices = @transform_5, window_bounds = array<i64: 256, 128>}, {pipeline_mode = #tpu.pipeline_mode<synchronous>, transform_indices = @transform_6, window_bounds = array<i64: 1, 128>}, {pipeline_mode = #tpu.pipeline_mode<synchronous>, transform_indices = @transform_7, window_bounds = array<i64: 128, 64>}, {pipeline_mode = #tpu.pipeline_mode<synchronous>, transform_indices = @transform_8, window_bounds = array<i64: 1, 64>}, {pipeline_mode = #tpu.pipeline_mode<synchronous>, transform_indices = @transform_9, window_bounds = array<i64: 64, 128>}, {pipeline_mode = #tpu.pipeline_mode<synchronous>, transform_indices = @transform_10, window_bounds = array<i64: 1, 128>}, {transform_indices = @transform_11, window_bounds = array<i64: 8, 128>}]} {
    %c0 = arith.constant 0 : index
    %c0_0 = arith.constant 0 : index
    %0 = vector.load %arg1[%c0, %c0_0] : memref<8x128xf32, #tpu.memory_space<vmem>>, vector<8x128xf32>
    %c0_1 = arith.constant 0 : index
    %c0_2 = arith.constant 0 : index
    %1 = vector.load %arg2[%c0_1, %c0_2] : memref<128x512xf32, #tpu.memory_space<vmem>>, vector<128x512xf32>
    %cst = arith.constant dense<0.000000e+00> : vector<8x512xf32>
    %2 = tpu.matmul %0, %1, %cst {dimension_numbers = #tpu.dot_dimension_numbers<[1], [0], [0], [1], [0, 0, 1, 1], [], []>} : vector<8x128xf32>, vector<128x512xf32>, vector<8x512xf32> -> vector<8x512xf32>
    %c0_3 = arith.constant 0 : index
    %c0_4 = arith.constant 0 : index
    %3 = vector.load %arg3[%c0_3, %c0_4] : memref<1x512xf32, #tpu.memory_space<vmem>>, vector<1x512xf32>
    %4 = vector.broadcast %3 : vector<1x512xf32> to vector<8x512xf32>
    %5 = arith.addf %2, %4 : vector<8x512xf32>
    %cst_5 = arith.constant 0.000000e+00 : f32
    %6 = vector.broadcast %cst_5 : f32 to vector<8x512xf32>
    %7 = arith.maximumf %5, %6 : vector<8x512xf32>
    %c0_6 = arith.constant 0 : index
    %c0_7 = arith.constant 0 : index
    %8 = vector.load %arg4[%c0_6, %c0_7] : memref<512x256xf32, #tpu.memory_space<vmem>>, vector<512x256xf32>
    %cst_8 = arith.constant dense<0.000000e+00> : vector<8x256xf32>
    %9 = tpu.matmul %7, %8, %cst_8 {dimension_numbers = #tpu.dot_dimension_numbers<[1], [0], [0], [1], [0, 0, 1, 1], [], []>} : vector<8x512xf32>, vector<512x256xf32>, vector<8x256xf32> -> vector<8x256xf32>
    %c0_9 = arith.constant 0 : index
    %c0_10 = arith.constant 0 : index
    %10 = vector.load %arg5[%c0_9, %c0_10] : memref<1x256xf32, #tpu.memory_space<vmem>>, vector<1x256xf32>
    %11 = vector.broadcast %10 : vector<1x256xf32> to vector<8x256xf32>
    %12 = arith.addf %9, %11 : vector<8x256xf32>
    %cst_11 = arith.constant 0.000000e+00 : f32
    %13 = vector.broadcast %cst_11 : f32 to vector<8x256xf32>
    %14 = arith.maximumf %12, %13 : vector<8x256xf32>
    %c0_12 = arith.constant 0 : index
    %c0_13 = arith.constant 0 : index
    %15 = vector.load %arg6[%c0_12, %c0_13] : memref<256x128xf32, #tpu.memory_space<vmem>>, vector<256x128xf32>
    %cst_14 = arith.constant dense<0.000000e+00> : vector<8x128xf32>
    %16 = tpu.matmul %14, %15, %cst_14 {dimension_numbers = #tpu.dot_dimension_numbers<[1], [0], [0], [1], [0, 0, 1, 1], [], []>} : vector<8x256xf32>, vector<256x128xf32>, vector<8x128xf32> -> vector<8x128xf32>
    %c0_15 = arith.constant 0 : index
    %c0_16 = arith.constant 0 : index
    %17 = vector.load %arg7[%c0_15, %c0_16] : memref<1x128xf32, #tpu.memory_space<vmem>>, vector<1x128xf32>
    %18 = vector.broadcast %17 : vector<1x128xf32> to vector<8x128xf32>
    %19 = arith.addf %16, %18 : vector<8x128xf32>
    %cst_17 = arith.constant 0.000000e+00 : f32
    %20 = vector.broadcast %cst_17 : f32 to vector<8x128xf32>
    %21 = arith.maximumf %19, %20 : vector<8x128xf32>
    %c0_18 = arith.constant 0 : index
    %c0_19 = arith.constant 0 : index
    %22 = vector.load %arg8[%c0_18, %c0_19] : memref<128x64xf32, #tpu.memory_space<vmem>>, vector<128x64xf32>
    %cst_20 = arith.constant dense<0.000000e+00> : vector<8x64xf32>
    %23 = tpu.matmul %21, %22, %cst_20 {dimension_numbers = #tpu.dot_dimension_numbers<[1], [0], [0], [1], [0, 0, 1, 1], [], []>} : vector<8x128xf32>, vector<128x64xf32>, vector<8x64xf32> -> vector<8x64xf32>
    %c0_21 = arith.constant 0 : index
    %c0_22 = arith.constant 0 : index
    %24 = vector.load %arg9[%c0_21, %c0_22] : memref<1x64xf32, #tpu.memory_space<vmem>>, vector<1x64xf32>
    %25 = vector.broadcast %24 : vector<1x64xf32> to vector<8x64xf32>
    %26 = arith.addf %23, %25 : vector<8x64xf32>
    %cst_23 = arith.constant 0.000000e+00 : f32
    %27 = vector.broadcast %cst_23 : f32 to vector<8x64xf32>
    %28 = arith.maximumf %26, %27 : vector<8x64xf32>
    %c0_24 = arith.constant 0 : index
    %c0_25 = arith.constant 0 : index
    %29 = vector.load %arg10[%c0_24, %c0_25] : memref<64x128xf32, #tpu.memory_space<vmem>>, vector<64x128xf32>
    %cst_26 = arith.constant dense<0.000000e+00> : vector<8x128xf32>
    %30 = tpu.matmul %28, %29, %cst_26 {dimension_numbers = #tpu.dot_dimension_numbers<[1], [0], [0], [1], [0, 0, 1, 1], [], []>} : vector<8x64xf32>, vector<64x128xf32>, vector<8x128xf32> -> vector<8x128xf32>
    %c0_27 = arith.constant 0 : index
    %c0_28 = arith.constant 0 : index
    %31 = vector.load %arg11[%c0_27, %c0_28] : memref<1x128xf32, #tpu.memory_space<vmem>>, vector<1x128xf32>
    %32 = vector.broadcast %31 : vector<1x128xf32> to vector<8x128xf32>
    %33 = arith.addf %30, %32 : vector<8x128xf32>
    %c0_29 = arith.constant 0 : index
    %c0_30 = arith.constant 0 : index
    %34 = vector.load %arg12[%c0_29, %c0_30] : memref<8x128xf32, #tpu.memory_space<vmem>>, vector<8x128xf32>
    tpu.vector_store %arg12[%c0_29, %c0_30], %33 {strides = array<i32>} : memref<8x128xf32, #tpu.memory_space<vmem>>, vector<8x128xf32>,
    return
  }
  func.func @transform_0(%arg0: i32) -> (i32, i32) {
    %c0_i32 = arith.constant 0 : i32
    %c0_i32_0 = arith.constant 0 : i32
    return %arg0, %c0_i32 : i32, i32
  }
  func.func @transform_1(%arg0: i32) -> (i32, i32) {
    %c0_i32 = arith.constant 0 : i32
    %c0_i32_0 = arith.constant 0 : i32
    %c0_i32_1 = arith.constant 0 : i32
    return %c0_i32, %c0_i32_0 : i32, i32
  }
  func.func @transform_2(%arg0: i32) -> (i32, i32) {
    %c0_i32 = arith.constant 0 : i32
    %c0_i32_0 = arith.constant 0 : i32
    %c0_i32_1 = arith.constant 0 : i32
    return %c0_i32, %c0_i32_0 : i32, i32
  }
  func.func @transform_3(%arg0: i32) -> (i32, i32) {
    %c0_i32 = arith.constant 0 : i32
    %c0_i32_0 = arith.constant 0 : i32
    %c0_i32_1 = arith.constant 0 : i32
    return %c0_i32, %c0_i32_0 : i32, i32
  }
  func.func @transform_4(%arg0: i32) -> (i32, i32) {
    %c0_i32 = arith.constant 0 : i32
    %c0_i32_0 = arith.constant 0 : i32
    %c0_i32_1 = arith.constant 0 : i32
    return %c0_i32, %c0_i32_0 : i32, i32
  }
  func.func @transform_5(%arg0: i32) -> (i32, i32) {
    %c0_i32 = arith.constant 0 : i32
    %c0_i32_0 = arith.constant 0 : i32
    %c0_i32_1 = arith.constant 0 : i32
    return %c0_i32, %c0_i32_0 : i32, i32
  }
  func.func @transform_6(%arg0: i32) -> (i32, i32) {
    %c0_i32 = arith.constant 0 : i32
    %c0_i32_0 = arith.constant 0 : i32
    %c0_i32_1 = arith.constant 0 : i32
    return %c0_i32, %c0_i32_0 : i32, i32
  }
  func.func @transform_7(%arg0: i32) -> (i32, i32) {
    %c0_i32 = arith.constant 0 : i32
    %c0_i32_0 = arith.constant 0 : i32
    %c0_i32_1 = arith.constant 0 : i32
    return %c0_i32, %c0_i32_0 : i32, i32
  }
  func.func @transform_8(%arg0: i32) -> (i32, i32) {
    %c0_i32 = arith.constant 0 : i32
    %c0_i32_0 = arith.constant 0 : i32
    %c0_i32_1 = arith.constant 0 : i32
    return %c0_i32, %c0_i32_0 : i32, i32
  }
  func.func @transform_9(%arg0: i32) -> (i32, i32) {
    %c0_i32 = arith.constant 0 : i32
    %c0_i32_0 = arith.constant 0 : i32
    %c0_i32_1 = arith.constant 0 : i32
    return %c0_i32, %c0_i32_0 : i32, i32
  }
  func.func @transform_10(%arg0: i32) -> (i32, i32) {
    %c0_i32 = arith.constant 0 : i32
    %c0_i32_0 = arith.constant 0 : i32
    %c0_i32_1 = arith.constant 0 : i32
    return %c0_i32, %c0_i32_0 : i32, i32
  }
  func.func @transform_11(%arg0: i32) -> (i32, i32) {
    %c0_i32 = arith.constant 0 : i32
    %c0_i32_0 = arith.constant 0 : i32
    return %arg0, %c0_i32 : i32, i32
  }
}

</mosaic_0001>

<bundles_post_ra>
// kernel: tpu_custom_call.1
= control target key start
LH: loop header
LB: loop body
LE: loop exit
PB: predicated region body
PF: predicated region fallthrough
CT: control target
= control target key end

     0   :  { %16 = vsyncpa [#allocation3], 0  ;;  %s1002_s0 = inlined_call_operand.vmem [shape: f32[8,128], index: 0, kind: input, shape index: {}]   ;;  %s1003_s1 = inlined_call_operand.hbm [shape: f32[128,512], index: 1, kind: input, shape index: {}]   ;;  %s1004_s2 = inlined_call_operand.vmem [shape: f32[1,512], index: 2, kind: input, shape index: {}]   ;;  %s1005_s3 = inlined_call_operand.hbm [shape: f32[512,256], index: 3, kind: input, shape index: {}]   ;;  %s1006_s4 = inlined_call_operand.vmem [shape: f32[1,256], index: 4, kind: input, shape index: {}]   ;;  %s1007_s5 = inlined_call_operand.hbm [shape: f32[256,128], index: 5, kind: input, shape index: {}]   ;;  %s1008_s6 = inlined_call_operand.vmem [shape: f32[1,128], index: 6, kind: input, shape index: {}]   ;;  %s1009_s7 = inlined_call_operand.vmem [shape: f32[128,64], index: 7, kind: input, shape index: {}]   ;;  %s1010_s8 = inlined_call_operand.vmem [shape: f32[1,64], index: 8, kind: input, shape index: {}]   ;;  %s1011_s9 = inlined_call_operand.vmem [shape: f32[64,128], index: 9, kind: input, shape index: {}]   ;;  %s1012_s10 = inlined_call_operand.vmem [shape: f32[1,128], index: 10, kind: input, shape index: {}]   ;;  %s1013_s11 = inlined_call_operand.hbm [shape: f32[8,128], index: 11, kind: output, shape index: {}]  }
   0x1   :  { %17 = vsyncpa [#allocation6], 0  ;;  %s40_s19 = sshll.u32 %s1005_s3, 4  ;;  %s41_s19 = int_to_ptr.hbm [resolvable:$true] %s40_s19 }
   0x2   :  { %18 = vsyncpa [#allocation4], 0  ;;  %s830_s20 = smov [#allocation5]   ;;  %s25_s24 = sshll.u32 %s1003_s1, 4  ;;  %s26_s24 = int_to_ptr.hbm [resolvable:$true] %s25_s24 }
   0x3   :  { %s42_s21 = sshll.u32 %s830_s20, 4  ;;  %s831_s25 = smov 256   ;;  %s43_s21 = int_to_ptr.vmem [resolvable:$true] %s42_s21 }
   0x4   :  { %s832_s26 = smov 16   ;;  %s833_s27 = smov [#allocation2]  }
   0x5   :  { %48 = dma.hbm_to_vmem [thread:$0]  %s41_s19, 16384, %s43_s21, [#allocation6], %s831_s25, %s831_s25, %s832_s26  }
   0x6   :  { %s27_s28 = sshll.u32 %s833_s27, 4  ;;  %s834_s29 = smov 512   ;;  %s28_s28 = int_to_ptr.vmem [resolvable:$true] %s27_s28 }
   0x7   :  { %s835_s30 = smov 32   ;;  %s55_s13 = sshll.u32 %s1007_s5, 4  ;;  %s56_s13 = int_to_ptr.hbm [resolvable:$true] %s55_s13 }
   0x8   :  { %33 = dma.hbm_to_vmem [thread:$0]  %s26_s24, 8192, %s28_s28, [#allocation3], %s834_s29, %s834_s29, %s835_s30  }
   0x9   :  { %s836_s14 = smov [#allocation7]   ;;  %s837_s16 = smov 128  }
   0xa   :  { %s57_s15 = sshll.u32 %s836_s14, 4  ;;  %s838_s1 = smov 8   ;;  %s58_s15 = int_to_ptr.vmem [resolvable:$true] %s57_s15 }
   0xb   :  { %63 = dma.hbm_to_vmem [thread:$0]  %s56_s13, 4096, %s58_s15, [#allocation6], %s837_s16, %s837_s16, %s838_s1  }
   0xc   :  { %824 = dma.done.wait [#allocation3], 8192  }
   0xd   :  { %825 = vsyncadd [#allocation3], 4294959104 }
   0xe   :  { %826 = dma.done.wait [#allocation6], 20480  }
   0xf   :  { %827 = vsyncadd [#allocation6], 4294946816  ;;  %v147_v0 = vld [vmem:[#allocation2 + $0x1e0] sm:$0xff]  ;;  %v149_v1 = vld [vmem:[#allocation2 + $0x1f0] sm:$0xff]  ;;  %vm671_vm0 = vcmask 523264   ;;  %s839_s22 = smov [#allocation8]  }
  0x10   :  { %v150_v2 = vld [vmem:[#allocation2 + $0x1f8] sm:$0xff]  ;;  %161 = vmatpush.msra.mxu0 %v147_v0  ;;  %201 = vmatpush.msra.mxu2 %v149_v1  ;;  %v143_v3 = vld [vmem:[#allocation2 + $0x1c0] sm:$0xff]  ;;  %v148_v4 = vld [vmem:[#allocation2 + $0x1e8] sm:$0xff]  ;;  %s701_s23 = sshll.u32 %s839_s22, 4  ;;  %s702_s23 = int_to_ptr.vmem [resolvable:$true] %s701_s23 }
  0x11   :  { %v145_v5 = vld [vmem:[#allocation2 + $0x1d0] sm:$0xff]  ;;  %221 = vmatpush.msra.mxu3 %v150_v2  ;;  %181 = vmatpush.msra.mxu1 %v148_v4  ;;  %v146_v6 = vld [vmem:[#allocation2 + $0x1d8] sm:$0xff]  ;;  %v139_v7 = vld [vmem:[#allocation2 + $0x1a0] sm:$0xff] }
  0x12   :  { %v144_v8 = vld [vmem:[#allocation2 + $0x1c8] sm:$0xff]  ;;  %162 = vmatpush.msra.mxu0 %v143_v3  ;;  %202 = vmatpush.msra.mxu2 %v145_v5  ;;  %v141_v9 = vld [vmem:[#allocation2 + $0x1b0] sm:$0xff]  ;;  %v142_v10 = vld [vmem:[#allocation2 + $0x1b8] sm:$0xff] }
  0x13   :  { %222 = vmatpush.msra.mxu3 %v146_v6  ;;  %182 = vmatpush.msra.mxu1 %v144_v8  ;;  %v135_v11 = vld [vmem:[#allocation2 + $0x180] sm:$0xff]  ;;  %v140_v12 = vld [vmem:[#allocation2 + $0x1a8] sm:$0xff]  ;;  %v137_v13 = vld [vmem:[#allocation2 + $0x190] sm:$0xff] }
  0x14   :  { %163 = vmatpush.msra.mxu0 %v139_v7  ;;  %203 = vmatpush.msra.mxu2 %v141_v9  ;;  %v138_v14 = vld [vmem:[#allocation2 + $0x198] sm:$0xff]  ;;  %v136_v15 = vld [vmem:[#allocation2 + $0x188] sm:$0xff]  ;;  %v131_v16 = vld [vmem:[#allocation2 + $0x160] sm:$0xff] }
  0x15   :  { %223 = vmatpush.msra.mxu3 %v142_v10  ;;  %183 = vmatpush.msra.mxu1 %v140_v12  ;;  %v133_v17 = vld [vmem:[#allocation2 + $0x170] sm:$0xff]  ;;  %v134_v18 = vld [vmem:[#allocation2 + $0x178] sm:$0xff]  ;;  %v132_v19 = vld [vmem:[#allocation2 + $0x168] sm:$0xff] }
  0x16   :  { %164 = vmatpush.msra.mxu0 %v135_v11  ;;  %204 = vmatpush.msra.mxu2 %v137_v13  ;;  %v127_v20 = vld [vmem:[#allocation2 + $0x140] sm:$0xff]  ;;  %v129_v21 = vld [vmem:[#allocation2 + $0x150] sm:$0xff]  ;;  %v130_v22 = vld [vmem:[#allocation2 + $0x158] sm:$0xff] }
  0x17   :  { %224 = vmatpush.msra.mxu3 %v138_v14  ;;  %184 = vmatpush.msra.mxu1 %v136_v15  ;;  %v128_v23 = vld [vmem:[#allocation2 + $0x148] sm:$0xff]  ;;  %v123_v24 = vld [vmem:[#allocation2 + $0x120] sm:$0xff]  ;;  %v125_v25 = vld [vmem:[#allocation2 + $0x130] sm:$0xff] }
  0x18   :  { %165 = vmatpush.msra.mxu0 %v131_v16  ;;  %205 = vmatpush.msra.mxu2 %v133_v17  ;;  %v126_v26 = vld [vmem:[#allocation2 + $0x138] sm:$0xff]  ;;  %v124_v27 = vld [vmem:[#allocation2 + $0x128] sm:$0xff]  ;;  %v119_v28 = vld [vmem:[#allocation2 + $0x100] sm:$0xff] }
  0x19   :  { %225 = vmatpush.msra.mxu3 %v134_v18  ;;  %185 = vmatpush.msra.mxu1 %v132_v19  ;;  %v121_v29 = vld [vmem:[#allocation2 + $0x110] sm:$0xff]  ;;  %v122_v30 = vld [vmem:[#allocation2 + $0x118] sm:$0xff]  ;;  %v120_v31 = vld [vmem:[#allocation2 + $0x108] sm:$0xff] }
  0x1a   :  { %166 = vmatpush.msra.mxu0 %v127_v20  ;;  %206 = vmatpush.msra.mxu2 %v129_v21  ;;  %v115_v32 = vld [vmem:[#allocation2 + $0xe0] sm:$0xff]  ;;  %v117_v33 = vld [vmem:[#allocation2 + $0xf0] sm:$0xff]  ;;  %v118_v34 = vld [vmem:[#allocation2 + $0xf8] sm:$0xff] }
  0x1b   :  { %226 = vmatpush.msra.mxu3 %v130_v22  ;;  %186 = vmatpush.msra.mxu1 %v128_v23  ;;  %v116_v35 = vld [vmem:[#allocation2 + $0xe8] sm:$0xff]  ;;  %v111_v36 = vld [vmem:[#allocation2 + $0xc0] sm:$0xff]  ;;  %v113_v37 = vld [vmem:[#allocation2 + $0xd0] sm:$0xff] }
  0x1c   :  { %167 = vmatpush.msra.mxu0 %v123_v24  ;;  %207 = vmatpush.msra.mxu2 %v125_v25  ;;  %v114_v38 = vld [vmem:[#allocation2 + $0xd8] sm:$0xff]  ;;  %v112_v39 = vld [vmem:[#allocation2 + $0xc8] sm:$0xff]  ;;  %v107_v40 = vld [vmem:[#allocation2 + $0xa0] sm:$0xff] }
  0x1d   :  { %227 = vmatpush.msra.mxu3 %v126_v26  ;;  %187 = vmatpush.msra.mxu1 %v124_v27  ;;  %v109_v41 = vld [vmem:[#allocation2 + $0xb0] sm:$0xff]  ;;  %v110_v42 = vld [vmem:[#allocation2 + $0xb8] sm:$0xff]  ;;  %v108_v43 = vld [vmem:[#allocation2 + $0xa8] sm:$0xff] }
  0x1e   :  { %168 = vmatpush.msra.mxu0 %v119_v28  ;;  %208 = vmatpush.msra.mxu2 %v121_v29  ;;  %v103_v44 = vld [vmem:[#allocation2 + $0x80] sm:$0xff]  ;;  %v105_v45 = vld [vmem:[#allocation2 + $0x90] sm:$0xff]  ;;  %v106_v46 = vld [vmem:[#allocation2 + $0x98] sm:$0xff] }
  0x1f   :  { %228 = vmatpush.msra.mxu3 %v122_v30  ;;  %188 = vmatpush.msra.mxu1 %v120_v31  ;;  %v104_v47 = vld [vmem:[#allocation2 + $0x88] sm:$0xff]  ;;  %v99_v48 = vld [vmem:[#allocation2 + $0x60] sm:$0xff]  ;;  %v101_v49 = vld [vmem:[#allocation2 + $0x70] sm:$0xff] }
  0x20   :  { %169 = vmatpush.msra.mxu0 %v115_v32  ;;  %209 = vmatpush.msra.mxu2 %v117_v33  ;;  %v102_v50 = vld [vmem:[#allocation2 + $0x78] sm:$0xff]  ;;  %v100_v51 = vld [vmem:[#allocation2 + $0x68] sm:$0xff]  ;;  %v95_v52 = vld [vmem:[#allocation2 + $0x40] sm:$0xff] }
  0x21   :  { %229 = vmatpush.msra.mxu3 %v118_v34  ;;  %189 = vmatpush.msra.mxu1 %v116_v35  ;;  %v97_v53 = vld [vmem:[#allocation2 + $0x50] sm:$0xff]  ;;  %v98_v54 = vld [vmem:[#allocation2 + $0x58] sm:$0xff]  ;;  %v96_v55 = vld [vmem:[#allocation2 + $0x48] sm:$0xff] }
  0x22   :  { %170 = vmatpush.msra.mxu0 %v111_v36  ;;  %210 = vmatpush.msra.mxu2 %v113_v37  ;;  %v91_v56 = vld [vmem:[#allocation2 + $0x20] sm:$0xff]  ;;  %v93_v57 = vld [vmem:[#allocation2 + $0x30] sm:$0xff]  ;;  %v94_v58 = vld [vmem:[#allocation2 + $0x38] sm:$0xff] }
  0x23   :  { %230 = vmatpush.msra.mxu3 %v114_v38  ;;  %190 = vmatpush.msra.mxu1 %v112_v39  ;;  %v92_v59 = vld [vmem:[#allocation2 + $0x28] sm:$0xff]  ;;  %v87_v60 = vld [vmem:[#allocation2] sm:$0xff]  ;;  %v89_v61 = vld [vmem:[#allocation2 + $0x10] sm:$0xff] }
  0x24   :  { %171 = vmatpush.msra.mxu0 %v107_v40  ;;  %211 = vmatpush.msra.mxu2 %v109_v41  ;;  %v90_v62 = vld [vmem:[#allocation2 + $0x18] sm:$0xff]  ;;  %v86_v63 = vld [vmem:[%s1002_s0] sm:$0xff]  ;;  %v88_v0 = vld [vmem:[#allocation2 + $0x8] sm:$0xff] }
  0x25   :  { %231 = vmatpush.msra.mxu3 %v110_v42  ;;  %191 = vmatpush.msra.mxu1 %v108_v43  ;;  %v275_v1 = vld [vmem:[#allocation5 + $0xf0] sm:$0xff]  ;;  %v273_v3 = vld [vmem:[#allocation5 + $0xe0] sm:$0xff] }
  0x26   :  { %172 = vmatpush.msra.mxu0 %v103_v44  ;;  %212 = vmatpush.msra.mxu2 %v105_v45  ;;  %v339_v2 = vld [vmem:[#allocation5 + $0x2f0] sm:$0xff]  ;;  %v337_v6 = vld [vmem:[#allocation5 + $0x2e0] sm:$0xff] }
  0x27   :  { %232 = vmatpush.msra.mxu3 %v106_v46  ;;  %192 = vmatpush.msra.mxu1 %v104_v47  ;;  %v307_v4 = vld [vmem:[#allocation5 + $0x1f0] sm:$0xff]  ;;  %v305_v8 = vld [vmem:[#allocation5 + $0x1e0] sm:$0xff] }
  0x28   :  { %173 = vmatpush.msra.mxu0 %v99_v48  ;;  %213 = vmatpush.msra.mxu2 %v101_v49  ;;  %v371_v5 = vld [vmem:[#allocation5 + $0x3f0] sm:$0xff]  ;;  %v369_v9 = vld [vmem:[#allocation5 + $0x3e0] sm:$0xff] }
  0x29   :  { %233 = vmatpush.msra.mxu3 %v102_v50  ;;  %193 = vmatpush.msra.mxu1 %v100_v51  ;;  %v271_v7 = vld [vmem:[#allocation5 + $0xd0] sm:$0xff]  ;;  %v269_v11 = vld [vmem:[#allocation5 + $0xc0] sm:$0xff] }
  0x2a   :  { %174 = vmatpush.msra.mxu0 %v95_v52  ;;  %214 = vmatpush.msra.mxu2 %v97_v53  ;;  %v335_v10 = vld [vmem:[#allocation5 + $0x2d0] sm:$0xff]  ;;  %v333_v14 = vld [vmem:[#allocation5 + $0x2c0] sm:$0xff] }
  0x2b   :  { %234 = vmatpush.msra.mxu3 %v98_v54  ;;  %194 = vmatpush.msra.mxu1 %v96_v55  ;;  %v303_v12 = vld [vmem:[#allocation5 + $0x1d0] sm:$0xff]  ;;  %v301_v16 = vld [vmem:[#allocation5 + $0x1c0] sm:$0xff] }
  0x2c   :  { %175 = vmatpush.msra.mxu0 %v91_v56  ;;  %215 = vmatpush.msra.mxu2 %v93_v57  ;;  %v367_v13 = vld [vmem:[#allocation5 + $0x3d0] sm:$0xff]  ;;  %v365_v17 = vld [vmem:[#allocation5 + $0x3c0] sm:$0xff] }
  0x2d   :  { %235 = vmatpush.msra.mxu3 %v94_v58  ;;  %195 = vmatpush.msra.mxu1 %v92_v59  ;;  %v267_v15 = vld [vmem:[#allocation5 + $0xb0] sm:$0xff]  ;;  %v265_v19 = vld [vmem:[#allocation5 + $0xa0] sm:$0xff] }
  0x2e   :  { %176 = vmatpush.msra.mxu0 %v87_v60  ;;  %216 = vmatpush.msra.mxu2 %v89_v61  ;;  %v331_v18 = vld [vmem:[#allocation5 + $0x2b0] sm:$0xff]  ;;  %v329_v22 = vld [vmem:[#allocation5 + $0x2a0] sm:$0xff]  ;;  %v276_v61 = vld [vmem:[#allocation5 + $0xf8] sm:$0xff] }
  0x2f   :  { %236 = vmatpush.msra.mxu3 %v90_v62  ;;  %177 = vmatmul.f32.vlgmr.msra.gmra.mxu0 %v86_v63  ;;  %v299_v20 = vld [vmem:[#allocation5 + $0x1b0] sm:$0xff]  ;;  %v297_v24 = vld [vmem:[#allocation5 + $0x1a0] sm:$0xff] }
  0x30   :  { %217 = vmatmul.f32.vlgmr.msra.gmra.mxu2 %v86_v63  ;;  %237 = vmatmul.f32.vlgmr.msra.gmra.mxu3 %v86_v63  ;;  %v363_v21 = vld [vmem:[#allocation5 + $0x3b0] sm:$0xff]  ;;  %v361_v25 = vld [vmem:[#allocation5 + $0x3a0] sm:$0xff] }
  0x31   :  { %196 = vmatpush.msra.mxu1 %v88_v0  ;;  %379 = vmatpush.msrb.mxu0 %v275_v1  ;;  %v263_v23 = vld [vmem:[#allocation5 + $0x90] sm:$0xff]  ;;  %v261_v27 = vld [vmem:[#allocation5 + $0x80] sm:$0xff]  ;;  %v274_v1 = vld [vmem:[#allocation5 + $0xe8] sm:$0xff] }
  0x32   :  { %197 = vmatmul.f32.vlgmr.msra.gmra.mxu1 %v86_v63  ;;  %419 = vmatpush.msrb.mxu2 %v339_v2  ;;  %v327_v26 = vld [vmem:[#allocation5 + $0x290] sm:$0xff]  ;;  %v325_v30 = vld [vmem:[#allocation5 + $0x280] sm:$0xff]  ;;  %v308_v2 = vld [vmem:[#allocation5 + $0x1f8] sm:$0xff] }
  0x33   :  { %380 = vmatpush.msrb.mxu0 %v273_v3  ;;  %399 = vmatpush.msrb.mxu1 %v307_v4  ;;  %v295_v28 = vld [vmem:[#allocation5 + $0x190] sm:$0xff]  ;;  %v293_v32 = vld [vmem:[#allocation5 + $0x180] sm:$0xff]  ;;  %v340_v4 = vld [vmem:[#allocation5 + $0x2f8] sm:$0xff] }
  0x34   :  { %439 = vmatpush.msrb.mxu3 %v371_v5  ;;  %420 = vmatpush.msrb.mxu2 %v337_v6  ;;  %v359_v29 = vld [vmem:[#allocation5 + $0x390] sm:$0xff]  ;;  %v357_v33 = vld [vmem:[#allocation5 + $0x380] sm:$0xff]  ;;  %v272_v5 = vld [vmem:[#allocation5 + $0xd8] sm:$0xff] }
  0x35   :  { %381 = vmatpush.msrb.mxu0 %v271_v7  ;;  %400 = vmatpush.msrb.mxu1 %v305_v8  ;;  %v259_v31 = vld [vmem:[#allocation5 + $0x70] sm:$0xff]  ;;  %v257_v35 = vld [vmem:[#allocation5 + $0x60] sm:$0xff]  ;;  %v306_v6 = vld [vmem:[#allocation5 + $0x1e8] sm:$0xff] }
  0x36   :  { %440 = vmatpush.msrb.mxu3 %v369_v9  ;;  %421 = vmatpush.msrb.mxu2 %v335_v10  ;;  %v323_v34 = vld [vmem:[#allocation5 + $0x270] sm:$0xff]  ;;  %v321_v38 = vld [vmem:[#allocation5 + $0x260] sm:$0xff]  ;;  %v372_v7 = vld [vmem:[#allocation5 + $0x3f8] sm:$0xff] }
  0x37   :  { %382 = vmatpush.msrb.mxu0 %v269_v11  ;;  %401 = vmatpush.msrb.mxu1 %v303_v12  ;;  %v291_v36 = vld [vmem:[#allocation5 + $0x170] sm:$0xff]  ;;  %v289_v40 = vld [vmem:[#allocation5 + $0x160] sm:$0xff]  ;;  %v338_v8 = vld [vmem:[#allocation5 + $0x2e8] sm:$0xff] }
  0x38   :  { %441 = vmatpush.msrb.mxu3 %v367_v13  ;;  %422 = vmatpush.msrb.mxu2 %v333_v14  ;;  %v355_v37 = vld [vmem:[#allocation5 + $0x370] sm:$0xff]  ;;  %v253_v41 = vld [vmem:[#allocation5 + $0x40] sm:$0xff]  ;;  %v270_v9 = vld [vmem:[#allocation5 + $0xc8] sm:$0xff] }
  0x39   :  { %383 = vmatpush.msrb.mxu0 %v267_v15  ;;  %402 = vmatpush.msrb.mxu1 %v301_v16  ;;  %v255_v39 = vld [vmem:[#allocation5 + $0x50] sm:$0xff]  ;;  %v353_v42 = vld [vmem:[#allocation5 + $0x360] sm:$0xff]  ;;  %v304_v10 = vld [vmem:[#allocation5 + $0x1d8] sm:$0xff] }
  0x3a   :  { %442 = vmatpush.msrb.mxu3 %v365_v17  ;;  %423 = vmatpush.msrb.mxu2 %v331_v18  ;;  %v319_v43 = vld [vmem:[#allocation5 + $0x250] sm:$0xff]  ;;  %v317_v46 = vld [vmem:[#allocation5 + $0x240] sm:$0xff]  ;;  %v370_v11 = vld [vmem:[#allocation5 + $0x3e8] sm:$0xff] }
  0x3b   :  { %384 = vmatpush.msrb.mxu0 %v265_v19  ;;  %403 = vmatpush.msrb.mxu1 %v299_v20  ;;  %v287_v44 = vld [vmem:[#allocation5 + $0x150] sm:$0xff]  ;;  %v285_v48 = vld [vmem:[#allocation5 + $0x140] sm:$0xff]  ;;  %v336_v12 = vld [vmem:[#allocation5 + $0x2d8] sm:$0xff] }
  0x3c   :  { %443 = vmatpush.msrb.mxu3 %v363_v21  ;;  %424 = vmatpush.msrb.mxu2 %v329_v22  ;;  %v351_v45 = vld [vmem:[#allocation5 + $0x350] sm:$0xff]  ;;  %v349_v49 = vld [vmem:[#allocation5 + $0x340] sm:$0xff]  ;;  %v268_v13 = vld [vmem:[#allocation5 + $0xb8] sm:$0xff] }
  0x3d   :  { %385 = vmatpush.msrb.mxu0 %v263_v23  ;;  %404 = vmatpush.msrb.mxu1 %v297_v24  ;;  %v251_v47 = vld [vmem:[#allocation5 + $0x30] sm:$0xff]  ;;  %v249_v51 = vld [vmem:[#allocation5 + $0x20] sm:$0xff]  ;;  %v302_v14 = vld [vmem:[#allocation5 + $0x1c8] sm:$0xff] }
  0x3e   :  { %444 = vmatpush.msrb.mxu3 %v361_v25  ;;  %425 = vmatpush.msrb.mxu2 %v327_v26  ;;  %v315_v50 = vld [vmem:[#allocation5 + $0x230] sm:$0xff]  ;;  %v313_v54 = vld [vmem:[#allocation5 + $0x220] sm:$0xff]  ;;  %v368_v15 = vld [vmem:[#allocation5 + $0x3d8] sm:$0xff] }
  0x3f   :  { %386 = vmatpush.msrb.mxu0 %v261_v27  ;;  %405 = vmatpush.msrb.mxu1 %v295_v28  ;;  %v283_v52 = vld [vmem:[#allocation5 + $0x130] sm:$0xff]  ;;  %v281_v56 = vld [vmem:[#allocation5 + $0x120] sm:$0xff]  ;;  %v334_v16 = vld [vmem:[#allocation5 + $0x2c8] sm:$0xff] }
  0x40   :  { %445 = vmatpush.msrb.mxu3 %v359_v29  ;;  %426 = vmatpush.msrb.mxu2 %v325_v30  ;;  %v347_v53 = vld [vmem:[#allocation5 + $0x330] sm:$0xff]  ;;  %v345_v57 = vld [vmem:[#allocation5 + $0x320] sm:$0xff]  ;;  %v266_v17 = vld [vmem:[#allocation5 + $0xa8] sm:$0xff] }
  0x41   :  { %387 = vmatpush.msrb.mxu0 %v259_v31  ;;  %406 = vmatpush.msrb.mxu1 %v293_v32  ;;  %v247_v55 = vld [vmem:[#allocation5 + $0x10] sm:$0xff]  ;;  %v245_v59 = vld [vmem:[#allocation5] sm:$0xff]  ;;  %v300_v18 = vld [vmem:[#allocation5 + $0x1b8] sm:$0xff] }
  0x42   :  { %446 = vmatpush.msrb.mxu3 %v357_v33  ;;  %427 = vmatpush.msrb.mxu2 %v323_v34  ;;  %v311_v58 = vld [vmem:[#allocation5 + $0x210] sm:$0xff]  ;;  %v277_v63 = vld [vmem:[#allocation5 + $0x100] sm:$0xff]  ;;  %v366_v19 = vld [vmem:[#allocation5 + $0x3c8] sm:$0xff] }
  0x43   :  { %388 = vmatpush.msrb.mxu0 %v257_v35  ;;  %407 = vmatpush.msrb.mxu1 %v291_v36  ;;  %v279_v60 = vld [vmem:[#allocation5 + $0x110] sm:$0xff]  ;;  %v309_v0 = vld [vmem:[#allocation5 + $0x200] sm:$0xff]  ;;  %v332_v20 = vld [vmem:[#allocation5 + $0x2b8] sm:$0xff] }
  0x44   :  { %447 = vmatpush.msrb.mxu3 %v355_v37  ;;  %428 = vmatpush.msrb.mxu2 %v321_v38  ;;  %v343_v62 = vld [vmem:[#allocation5 + $0x310] sm:$0xff]  ;;  %v341_v3 = vld [vmem:[#allocation5 + $0x300] sm:$0xff]  ;;  %v264_v21 = vld [vmem:[#allocation5 + $0x98] sm:$0xff] }
  0x45   :  { %389 = vmatpush.msrb.mxu0 %v255_v39  ;;  %408 = vmatpush.msrb.mxu1 %v289_v40  ;;  %v298_v22 = vld [vmem:[#allocation5 + $0x1a8] sm:$0xff]  ;;  %v364_v23 = vld [vmem:[#allocation5 + $0x3b8] sm:$0xff] }
  0x46   :  { %448 = vmatpush.msrb.mxu3 %v353_v42  ;;  %429 = vmatpush.msrb.mxu2 %v319_v43  ;;  %v330_v24 = vld [vmem:[#allocation5 + $0x2a8] sm:$0xff]  ;;  %v296_v26 = vld [vmem:[#allocation5 + $0x198] sm:$0xff] }
  0x47   :  { %390 = vmatpush.msrb.mxu0 %v253_v41  ;;  %409 = vmatpush.msrb.mxu1 %v287_v44  ;;  %v262_v25 = vld [vmem:[#allocation5 + $0x88] sm:$0xff]  ;;  %v260_v28 = vld [vmem:[#allocation5 + $0x78] sm:$0xff] }
  0x48   :  { %449 = vmatpush.msrb.mxu3 %v351_v45  ;;  %430 = vmatpush.msrb.mxu2 %v317_v46  ;;  %v362_v27 = vld [vmem:[#allocation5 + $0x3a8] sm:$0xff]  ;;  %v292_v31 = vld [vmem:[#allocation5 + $0x178] sm:$0xff] }
  0x49   :  { %391 = vmatpush.msrb.mxu0 %v251_v47  ;;  %410 = vmatpush.msrb.mxu1 %v285_v48  ;;  %v294_v29 = vld [vmem:[#allocation5 + $0x188] sm:$0xff]  ;;  %v328_v32 = vld [vmem:[#allocation5 + $0x298] sm:$0xff] }
  0x4a   :  { %450 = vmatpush.msrb.mxu3 %v349_v49  ;;  %431 = vmatpush.msrb.mxu2 %v315_v50  ;;  %v258_v30 = vld [vmem:[#allocation5 + $0x68] sm:$0xff]  ;;  %v360_v33 = vld [vmem:[#allocation5 + $0x398] sm:$0xff] }
  0x4b   :  { %392 = vmatpush.msrb.mxu0 %v249_v51  ;;  %411 = vmatpush.msrb.mxu1 %v283_v52  ;;  %v256_v34 = vld [vmem:[#allocation5 + $0x58] sm:$0xff]  ;;  %v290_v35 = vld [vmem:[#allocation5 + $0x168] sm:$0xff] }
  0x4c   :  { %451 = vmatpush.msrb.mxu3 %v347_v53  ;;  %432 = vmatpush.msrb.mxu2 %v313_v54  ;;  %v326_v36 = vld [vmem:[#allocation5 + $0x288] sm:$0xff]  ;;  %v288_v39 = vld [vmem:[#allocation5 + $0x158] sm:$0xff] }
  0x4d   :  { %393 = vmatpush.msrb.mxu0 %v247_v55  ;;  %412 = vmatpush.msrb.mxu1 %v281_v56  ;;  %v358_v37 = vld [vmem:[#allocation5 + $0x388] sm:$0xff]  ;;  %v324_v40 = vld [vmem:[#allocation5 + $0x278] sm:$0xff] }
  0x4e   :  { %452 = vmatpush.msrb.mxu3 %v345_v57  ;;  %433 = vmatpush.msrb.mxu2 %v311_v58  ;;  %v254_v38 = vld [vmem:[#allocation5 + $0x48] sm:$0xff]  ;;  %v356_v41 = vld [vmem:[#allocation5 + $0x378] sm:$0xff] }
  0x4f   :  { %394 = vmatpush.msrb.mxu0 %v245_v59  ;;  %413 = vmatpush.msrb.mxu1 %v279_v60  ;;  %v252_v42 = vld [vmem:[#allocation5 + $0x38] sm:$0xff]  ;;  %v286_v43 = vld [vmem:[#allocation5 + $0x148] sm:$0xff] }
  0x50   :  { %453 = vmatpush.msrb.mxu3 %v343_v62  ;;  %434 = vmatpush.msrb.mxu2 %v309_v0  ;;  %v322_v44 = vld [vmem:[#allocation5 + $0x268] sm:$0xff]  ;;  %v284_v47 = vld [vmem:[#allocation5 + $0x138] sm:$0xff] }
  0x51   :  { %459 = vmatpush.msra.mxu0 %v276_v61  ;;  %414 = vmatpush.msrb.mxu1 %v277_v63  ;;  %v354_v45 = vld [vmem:[#allocation5 + $0x368] sm:$0xff]  ;;  %v320_v48 = vld [vmem:[#allocation5 + $0x258] sm:$0xff] }
  0x52   :  { %454 = vmatpush.msrb.mxu3 %v341_v3  ;;  %499 = vmatpush.msra.mxu2 %v340_v4  ;;  %v250_v46 = vld [vmem:[#allocation5 + $0x28] sm:$0xff]  ;;  %v352_v49 = vld [vmem:[#allocation5 + $0x358] sm:$0xff] }
  0x53   :  { %460 = vmatpush.msra.mxu0 %v274_v1  ;;  %479 = vmatpush.msra.mxu1 %v308_v2  ;;  %v248_v50 = vld [vmem:[#allocation5 + $0x18] sm:$0xff]  ;;  %v282_v51 = vld [vmem:[#allocation5 + $0x128] sm:$0xff]  ;;  %v151_v1 = vld [vmem:[%s1004_s2] sm:$0xf] }
  0x54   :  { %519 = vmatpush.msra.mxu3 %v372_v7  ;;  %500 = vmatpush.msra.mxu2 %v338_v8  ;;  %v318_v52 = vld [vmem:[#allocation5 + $0x248] sm:$0xff]  ;;  %v280_v55 = vld [vmem:[#allocation5 + $0x118] sm:$0xff]  ;;  %v153_v2 = vperm.slane %v151_v1, 0  ;;  %v154_v4 = vperm.slane %v151_v1, 1 }
  0x55   :  { %461 = vmatpush.msra.mxu0 %v272_v5  ;;  %480 = vmatpush.msra.mxu1 %v306_v6  ;;  %v350_v53 = vld [vmem:[#allocation5 + $0x348] sm:$0xff]  ;;  %v316_v56 = vld [vmem:[#allocation5 + $0x238] sm:$0xff] }
  0x56   :  { %520 = vmatpush.msra.mxu3 %v370_v11  ;;  %501 = vmatpush.msra.mxu2 %v336_v12  ;;  %v246_v54 = vld [vmem:[#allocation5 + $0x8] sm:$0xff]  ;;  %v348_v57 = vld [vmem:[#allocation5 + $0x338] sm:$0xff]  ;;  %v156_v11 = vperm.slane %v151_v1, 3  ;;  %v555_v12 = vld [vmem:[#allocation7 + $0x70] sm:$0xff] }
  0x57   :  { %462 = vmatpush.msra.mxu0 %v270_v9  ;;  %481 = vmatpush.msra.mxu1 %v304_v10  ;;  %v278_v58 = vld [vmem:[#allocation5 + $0x108] sm:$0xff]  ;;  %v312_v61 = vld [vmem:[#allocation5 + $0x218] sm:$0xff]  ;;  %v155_v10 = vperm.slane %v151_v1, 2 }
  0x58   :  { %521 = vmatpush.msra.mxu3 %v368_v15  ;;  %502 = vmatpush.msra.mxu2 %v334_v16  ;;  %v314_v59 = vld [vmem:[#allocation5 + $0x228] sm:$0xff]  ;;  %v344_v62 = vld [vmem:[#allocation5 + $0x318] sm:$0xff] }
  0x59   :  { %463 = vmatpush.msra.mxu0 %v268_v13  ;;  %482 = vmatpush.msra.mxu1 %v302_v14  ;;  %v346_v60 = vld [vmem:[#allocation5 + $0x328] sm:$0xff]  ;;  %v556_v8 = vld [vmem:[#allocation7 + $0x78] sm:$0xff] }
  0x5a   :  { %522 = vmatpush.msra.mxu3 %v366_v19  ;;  %503 = vmatpush.msra.mxu2 %v332_v20  ;;  %v310_v63 = vld [vmem:[#allocation5 + $0x208] sm:$0xff]  ;;  %v572_v14 = vld [vmem:[#allocation7 + $0xf8] sm:$0xff]  ;;  %v571_v20 = vld [vmem:[#allocation7 + $0xf0] sm:$0xff] }
  0x5b   :  { %464 = vmatpush.msra.mxu0 %v266_v17  ;;  %483 = vmatpush.msra.mxu1 %v300_v18  ;;  %v342_v0 = vld [vmem:[#allocation5 + $0x308] sm:$0xff] }
  0x5c   :  { %523 = vmatpush.msra.mxu3 %v364_v23  ;;  %504 = vmatpush.msra.mxu2 %v330_v24  ;;  %v554_v17 = vld [vmem:[#allocation7 + $0x68] sm:$0xff]  ;;  %v553_v23 = vld [vmem:[#allocation7 + $0x60] sm:$0xff]  ;;  %v552_v24 = vld [vmem:[#allocation7 + $0x58] sm:$0xff] }
  0x5d   :  { %465 = vmatpush.msra.mxu0 %v264_v21  ;;  %484 = vmatpush.msra.mxu1 %v298_v22 }
  0x5e   :  { %524 = vmatpush.msra.mxu3 %v362_v27  ;;  %505 = vmatpush.msra.mxu2 %v328_v32  ;;  %v570_v27 = vld [vmem:[#allocation7 + $0xe8] sm:$0xff]  ;;  %v547_v32 = vld [vmem:[#allocation7 + $0x30] sm:$0xff] }
  0x5f   :  { %466 = vmatpush.msra.mxu0 %v262_v25  ;;  %485 = vmatpush.msra.mxu1 %v296_v26  ;;  %v551_v25 = vld [vmem:[#allocation7 + $0x50] sm:$0xff]  ;;  %v550_v26 = vld [vmem:[#allocation7 + $0x48] sm:$0xff] }
  0x60   :  { %525 = vmatpush.msra.mxu3 %v360_v33  ;;  %506 = vmatpush.msra.mxu2 %v326_v36  ;;  %v567_v33 = vld [vmem:[#allocation7 + $0xd0] sm:$0xff]  ;;  %v545_v36 = vld [vmem:[#allocation7 + $0x20] sm:$0xff] }
  0x61   :  { %467 = vmatpush.msra.mxu0 %v260_v28  ;;  %486 = vmatpush.msra.mxu1 %v294_v29  ;;  %v549_v28 = vld [vmem:[#allocation7 + $0x40] sm:$0xff] }
  0x62   :  { %526 = vmatpush.msra.mxu3 %v358_v37  ;;  %507 = vmatpush.msra.mxu2 %v324_v40  ;;  %v569_v29 = vld [vmem:[#allocation7 + $0xe0] sm:$0xff]  ;;  %v543_v40 = vld [vmem:[#allocation7 + $0x10] sm:$0xff] }
  0x63   :  { %468 = vmatpush.msra.mxu0 %v258_v30  ;;  %487 = vmatpush.msra.mxu1 %v292_v31  ;;  %v548_v30 = vld [vmem:[#allocation7 + $0x38] sm:$0xff]  ;;  %v565_v37 = vld [vmem:[#allocation7 + $0xc0] sm:$0xff] }
  0x64   :  { %527 = vmatpush.msra.mxu3 %v356_v41  ;;  %508 = vmatpush.msra.mxu2 %v322_v44  ;;  %v568_v31 = vld [vmem:[#allocation7 + $0xd8] sm:$0xff]  ;;  %v563_v41 = vld [vmem:[#allocation7 + $0xb0] sm:$0xff]  ;;  %v541_v44 = vld [vmem:[#allocation7] sm:$0xff] }
  0x65   :  { %469 = vmatpush.msra.mxu0 %v256_v34  ;;  %488 = vmatpush.msra.mxu1 %v290_v35  ;;  %v546_v34 = vld [vmem:[#allocation7 + $0x28] sm:$0xff] }
  0x66   :  { %528 = vmatpush.msra.mxu3 %v354_v45  ;;  %509 = vmatpush.msra.mxu2 %v320_v48  ;;  %v566_v35 = vld [vmem:[#allocation7 + $0xc8] sm:$0xff]  ;;  %v561_v45 = vld [vmem:[#allocation7 + $0xa0] sm:$0xff] }
  0x67   :  { %470 = vmatpush.msra.mxu0 %v254_v38  ;;  %489 = vmatpush.msra.mxu1 %v288_v39  ;;  %v544_v38 = vld [vmem:[#allocation7 + $0x18] sm:$0xff]  ;;  %v558_v48 = vld [vmem:[#allocation7 + $0x88] sm:$0xff] }
  0x68   :  { %529 = vmatpush.msra.mxu3 %v352_v49  ;;  %510 = vmatpush.msra.mxu2 %v318_v52  ;;  %v564_v39 = vld [vmem:[#allocation7 + $0xb8] sm:$0xff]  ;;  %v557_v49 = vld [vmem:[#allocation7 + $0x80] sm:$0xff]  ;;  %v631_v52 = vld [vmem:[%s1009_s7 + $0x68] sm:$0xff] }
  0x69   :  { %471 = vmatpush.msra.mxu0 %v252_v42  ;;  %490 = vmatpush.msra.mxu1 %v286_v43  ;;  %v542_v42 = vld [vmem:[#allocation7 + $0x8] sm:$0xff] }
  0x6a   :  { %530 = vmatpush.msra.mxu3 %v350_v53  ;;  %511 = vmatpush.msra.mxu2 %v316_v56  ;;  %v562_v43 = vld [vmem:[#allocation7 + $0xa8] sm:$0xff]  ;;  %v373_v53 = vld [vmem:[%s1006_s4] sm:$0x3] }
  0x6b   :  { %472 = vmatpush.msra.mxu0 %v250_v46  ;;  %491 = vmatpush.msra.mxu1 %v284_v47  ;;  %v560_v46 = vld [vmem:[#allocation7 + $0x98] sm:$0xff]  ;;  %v559_v47 = vld [vmem:[#allocation7 + $0x90] sm:$0xff]  ;;  %v376_v1 = vperm.slane %v373_v53, 1 }
  0x6c   :  { %531 = vmatpush.msra.mxu3 %v348_v57  ;;  %512 = vmatpush.msra.mxu2 %v314_v59  ;;  %v629_v57 = vld [vmem:[%s1009_s7 + $0x58] sm:$0xff] }
  0x6d   :  { %473 = vmatpush.msra.mxu0 %v248_v50  ;;  %492 = vmatpush.msra.mxu1 %v282_v51  ;;  %v633_v50 = vld [vmem:[%s1009_s7 + $0x78] sm:$0xff]  ;;  %v632_v51 = vld [vmem:[%s1009_s7 + $0x70] sm:$0xff] }
  0x6e   :  { %532 = vmatpush.msra.mxu3 %v346_v60  ;;  %513 = vmatpush.msra.mxu2 %v312_v61  ;;  %v627_v60 = vld [vmem:[%s1009_s7 + $0x48] sm:$0xff] }
  0x6f   :  { %474 = vmatpush.msra.mxu0 %v246_v54  ;;  %493 = vmatpush.msra.mxu1 %v280_v55  ;;  %v630_v54 = vld [vmem:[%s1009_s7 + $0x60] sm:$0xff]  ;;  %v375_v55 = vperm.slane %v373_v53, 0 }
  0x70   :  { %533 = vmatpush.msra.mxu3 %v344_v62  ;;  %514 = vmatpush.msra.mxu2 %v310_v63  ;;  %v626_v62 = vld [vmem:[%s1009_s7 + $0x40] sm:$0xff] }
  0x71   :  { %494 = vmatpush.msra.mxu1 %v278_v58  ;;  %v628_v58 = vld [vmem:[%s1009_s7 + $0x50] sm:$0xff] }
  0x72   :  { %534 = vmatpush.msra.mxu3 %v342_v0  ;;  %v625_v0 = vld [vmem:[%s1009_s7 + $0x38] sm:$0xff] }
  0xac   :  { %v178_v3 = vpop.f32.mrf.mxu0 }
  0xad   :  { %v179_v5 = vadd.f32 %v178_v3, %v153_v2 }
  0xaf   :  { %v241_v6 = vmax.f32 %v179_v5, 0.0  ;;  %v198_v7 = vpop.f32.mrf.mxu1 }
  0xb0   :  { %v199_v9 = vadd.f32 %v198_v7, %v154_v4 }
  0xb1   :  { %395 = vmatmul.f32.vlgmr.msrb.gmra.mxu0 %v241_v6 }
  0xb2   :  { %v242_v13 = vmax.f32 %v199_v9, 0.0  ;;  %577 = vmatpush.msrb.mxu0 %v556_v8 }
  0xb3   :  { %v218_v15 = vpop.f32.mrf.mxu2  ;;  %v238_v16 = vpop.f32.mrf.mxu3 }
  0xb4   :  { %v219_v18 = vadd.f32 %v218_v15, %v155_v10  ;;  %v239_v19 = vadd.f32 %v238_v16, %v156_v11  ;;  %415 = vmatmul.f32.vlgmr.msrb.gmra.mxu1 %v242_v13  ;;  %578 = vmatpush.msrb.mxu0 %v555_v12  ;;  %v624_v16 = vld [vmem:[%s1009_s7 + $0x30] sm:$0xff] }
  0xb5   :  { %597 = vmatpush.msrb.mxu1 %v572_v14 }
  0xb6   :  { %v243_v21 = vmax.f32 %v219_v18, 0.0  ;;  %v244_v22 = vmax.f32 %v239_v19, 0.0  ;;  %579 = vmatpush.msrb.mxu0 %v554_v17  ;;  %v623_v17 = vld [vmem:[%s1009_s7 + $0x28] sm:$0xff]  ;;  %v622_v18 = vld [vmem:[%s1009_s7 + $0x20] sm:$0xff]  ;;  %v621_v19 = vld [vmem:[%s1009_s7 + $0x18] sm:$0xff] }
  0xb7   :  { %598 = vmatpush.msrb.mxu1 %v571_v20  ;;  %v620_v20 = vld [vmem:[%s1009_s7 + $0x10] sm:$0xff] }
  0xb8   :  { %435 = vmatmul.f32.vlgmr.msrb.gmra.mxu2 %v243_v21  ;;  %455 = vmatmul.f32.vlgmr.msrb.gmra.mxu3 %v244_v22 }
  0xb9   :  { %475 = vmatmul.f32.vlgmr.msra.gmra.mxu0 %v241_v6  ;;  %599 = vmatpush.msrb.mxu1 %v570_v27  ;;  %v662_v27 = vld [vmem:[%s1011_s9 + $0x18] sm:$0xff] }
  0xba   :  { %580 = vmatpush.msrb.mxu0 %v553_v23  ;;  %638 = vmatpush.msrb.mxu2 %v633_v50  ;;  %v666_v23 = vld [vmem:[%s1011_s9 + $0x38] sm:$0xff] }
  0xbb   :  { %600 = vmatpush.msrb.mxu1 %v569_v29  ;;  %683 = vmatpush.msrb.mxu3 %v666_v23 }
  0xbc   :  { %495 = vmatmul.f32.vlgmr.msra.gmra.mxu1 %v242_v13  ;;  %581 = vmatpush.msrb.mxu0 %v552_v24  ;;  %v665_v24 = vld [vmem:[%s1011_s9 + $0x30] sm:$0xff] }
  0xbd   :  { %601 = vmatpush.msrb.mxu1 %v568_v31  ;;  %639 = vmatpush.msrb.mxu2 %v632_v51 }
  0xbe   :  { %582 = vmatpush.msrb.mxu0 %v551_v25  ;;  %v664_v25 = vld [vmem:[%s1011_s9 + $0x28] sm:$0xff]  ;;  %684 = vmatpush.msrb.mxu3 %v665_v24 }
  0xbf   :  { %602 = vmatpush.msrb.mxu1 %v567_v33  ;;  %640 = vmatpush.msrb.mxu2 %v631_v52 }
  0xc0   :  { %515 = vmatmul.f32.vlgmr.msra.gmra.mxu2 %v243_v21  ;;  %535 = vmatmul.f32.vlgmr.msra.gmra.mxu3 %v244_v22  ;;  %v619_v21 = vld [vmem:[%s1009_s7 + $0x8] sm:$0xff]  ;;  %v618_v22 = vld [vmem:[%s1009_s7] sm:$0xff] }
  0xc1   :  { %583 = vmatpush.msrb.mxu0 %v550_v26  ;;  %603 = vmatpush.msrb.mxu1 %v566_v35  ;;  %v663_v26 = vld [vmem:[%s1011_s9 + $0x20] sm:$0xff]  ;;  %v660_v35 = vld [vmem:[%s1011_s9 + $0x8] sm:$0xff] }
  0xc2   :  { %641 = vmatpush.msrb.mxu2 %v630_v54  ;;  %685 = vmatpush.msrb.mxu3 %v664_v25 }
  0xc3   :  { %584 = vmatpush.msrb.mxu0 %v549_v28  ;;  %604 = vmatpush.msrb.mxu1 %v565_v37  ;;  %v725_v28 = vld [vmem:[%s1008_s6] ss:$0 sm:$0xff] }
  0xc4   :  { %642 = vmatpush.msrb.mxu2 %v629_v57  ;;  %686 = vmatpush.msrb.mxu3 %v663_v26  ;;  %v726_v37 = vld [vmem:[%s1010_s8] ss:$0 sm:$0xff] }
  0xc5   :  { %585 = vmatpush.msrb.mxu0 %v548_v30  ;;  %605 = vmatpush.msrb.mxu1 %v564_v39 }
  0xc6   :  { %643 = vmatpush.msrb.mxu2 %v628_v58  ;;  %687 = vmatpush.msrb.mxu3 %v662_v27 }
  0xc7   :  { %586 = vmatpush.msrb.mxu0 %v547_v32  ;;  %606 = vmatpush.msrb.mxu1 %v563_v41  ;;  %v727_v41 = vld [vmem:[%s1012_s10] ss:$0 sm:$0xff] }
  0xc8   :  { %644 = vmatpush.msrb.mxu2 %v627_v60 }
  0xc9   :  { %587 = vmatpush.msrb.mxu0 %v546_v34  ;;  %607 = vmatpush.msrb.mxu1 %v562_v43  ;;  %v661_v34 = vld [vmem:[%s1011_s9 + $0x10] sm:$0xff] }
  0xca   :  { %645 = vmatpush.msrb.mxu2 %v626_v62  ;;  %688 = vmatpush.msrb.mxu3 %v661_v34 }
  0xcb   :  { %588 = vmatpush.msrb.mxu0 %v545_v36  ;;  %608 = vmatpush.msrb.mxu1 %v561_v45  ;;  %v659_v36 = vld [vmem:[%s1011_s9] sm:$0xff]  ;;  %s703_s9 = sshll.u32 %s1013_s11, 4  ;;  %s704_s9 = int_to_ptr.hbm [resolvable:$true] %s703_s9 }
  0xcc   :  { %646 = vmatpush.msrb.mxu2 %v625_v0  ;;  %689 = vmatpush.msrb.mxu3 %v660_v35 }
  0xcd   :  { %589 = vmatpush.msrb.mxu0 %v544_v38  ;;  %609 = vmatpush.msrb.mxu1 %v560_v46 }
  0xce   :  { %647 = vmatpush.msrb.mxu2 %v624_v16  ;;  %690 = vmatpush.msrb.mxu3 %v659_v36 }
  0xcf   :  { %590 = vmatpush.msrb.mxu0 %v543_v40  ;;  %610 = vmatpush.msrb.mxu1 %v559_v47 }
  0xd0   :  { %648 = vmatpush.msrb.mxu2 %v623_v17 }
  0xd1   :  { %591 = vmatpush.msrb.mxu0 %v542_v42  ;;  %611 = vmatpush.msrb.mxu1 %v558_v48 }
  0xd2   :  { %649 = vmatpush.msrb.mxu2 %v622_v18 }
  0xd3   :  { %592 = vmatpush.msrb.mxu0 %v541_v44  ;;  %612 = vmatpush.msrb.mxu1 %v557_v49 }
  0xd4   :  { %650 = vmatpush.msrb.mxu2 %v621_v19 }
  0xd6   :  { %651 = vmatpush.msrb.mxu2 %v620_v20 }
  0xd8   :  { %652 = vmatpush.msrb.mxu2 %v619_v21 }
  0xda   :  { %653 = vmatpush.msrb.mxu2 %v618_v22 }
 0x12e   :  { %v396_v56 = vpop.f32.mrf.mxu0 }
 0x12f   :  { %v397_v59 = vadd.f32 %v396_v56, %v375_v55 }
 0x131   :  { %v416_v61 = vpop.f32.mrf.mxu1 }
 0x132   :  { %v417_v63 = vadd.f32 %v416_v61, %v397_v59 }
 0x136   :  { %v476_v2 = vpop.f32.mrf.mxu0 }
 0x137   :  { %v477_v6 = vadd.f32 %v476_v2, %v376_v1 }
 0x139   :  { %v496_v8 = vpop.f32.mrf.mxu1 }
 0x13a   :  { %v497_v10 = vadd.f32 %v496_v8, %v477_v6 }
 0x13b   :  { %v436_v3 = vpop.f32.mrf.mxu2  ;;  %v456_v4 = vpop.f32.mrf.mxu3 }
 0x13c   :  { %v437_v5 = vadd.f32 %v436_v3, %v417_v63 }
 0x13e   :  { %v457_v7 = vadd.f32 %v456_v4, %v437_v5 }
 0x140   :  { %v539_v9 = vmax.f32 %v457_v7, 0.0 }
 0x142   :  { %593 = vmatmul.f32.vlgmr.msrb.gmra.mxu0 %v539_v9 }
 0x143   :  { %v516_v11 = vpop.f32.mrf.mxu2  ;;  %v536_v13 = vpop.f32.mrf.mxu3 }
 0x144   :  { %v517_v12 = vadd.f32 %v516_v11, %v497_v10 }
 0x146   :  { %v537_v14 = vadd.f32 %v536_v13, %v517_v12 }
 0x148   :  { %v540_v15 = vmax.f32 %v537_v14, 0.0 }
 0x14a   :  { %613 = vmatmul.f32.vlgmr.msrb.gmra.mxu1 %v540_v15 }
 0x1bf   :  { %v594_v29 = vpop.f32.mrf.mxu0 }
 0x1c0   :  { %v595_v30 = vadd.f32 %v725_v28, %v594_v29 }
 0x1c7   :  { %v614_v31 = vpop.f32.mrf.mxu1 }
 0x1c8   :  { %v615_v32 = vadd.f32 %v614_v31, %v595_v30 }
 0x1ca   :  { %v617_v33 = vmax.f32 %v615_v32, 0.0 }
 0x1cc   :  { %654 = vmatmul.f32.vlgmr.msrb.gmra.mxu2 %v617_v33 }
 0x24f   :  { %v655_v38 = vpop.f32.mrf.mxu2 }
 0x250   :  { %v656_v39 = vadd.f32 %v726_v37, %v655_v38 }
 0x252   :  { %v658_v40 = vmax.f32 %v656_v39, 0.0 }
 0x254   :  { %714 = vmatmul.msk.f32.vlgmr.msrb.gmra.mxu3 %vm671_vm0, %v658_v40 }
 0x2d7   :  { %v692_v42 = vpop.f32.mrf.mxu3 }
 0x2d8   :  { %v693_v43 = vadd.f32 %v727_v41, %v692_v42 }
 0x2da   :  { %695 = vst [vmem:[#allocation8] sm:$0xff] %v693_v43 }
 0x2db   :  { %706 = dma.vmem_to_hbm [thread:$0]  %s702_s23, 128, %s704_s9, [#allocation4]  }
 0x2dc   :  { %828 = dma.done.wait [#allocation4], 128  }
 0x2dd   :  { %829 = vsyncadd [#allocation4], 4294967168 }
 0x2de   :  { %711 = vsyncpa [#allocation3], 1 }
 0x2df   :  { %712 = vsyncpa [#allocation6], 1 }
 0x2e0   :  { %713 = vsyncpa [#allocation4], 1 }

</bundles_post_ra>
